<compile_context>
chip_gen: v6e
topology: v6e:2x2x1
jax: 0.10.0
libtpu: 0.0.40
codegen_flags: <defaults>
</compile_context>

<pallas_src>
import jax
import jax.numpy as jnp
from jax.experimental import pallas as pl
from jax.experimental.pallas import tpu as pltpu

# ---- problem sizes (small, consistent with the module) ----
B = 2          # batch
N = 8          # sequence length (tokens)
DIM = 32       # embedding dim
HEADS = 4
DIM_HEAD = 16
INNER = HEADS * DIM_HEAD          # 64
SCALE = DIM_HEAD ** -0.5
F_QK = 2 * INNER                  # 128   (q block | k block)
F_TOTAL = F_QK + HEADS * DIM      # 256   (q | k | folded per-head v')


def attention_kernel(x_ref, w_ref, bout_ref, o_ref):
    # x_ref   : (B, N, DIM)
    # w_ref   : (DIM, F_TOTAL) = [ Wq*scale | Wk | Wv@Wo (per head, flattened) ]
    # bout_ref: (1, DIM)
    # o_ref   : (B, N, DIM)
    x2 = x_ref[...].reshape(B * N, DIM)

    # One lane-dense MXU matmul for ALL projections (q, k and the folded v').
    fused = jnp.dot(x2, w_ref[...], preferred_element_type=jnp.float32)
    fused = fused.reshape(B, N, F_TOTAL)

    acc = jnp.zeros((B, N, DIM), jnp.float32)
    # Per-head attention math (inherently per-head); static unroll over 4 heads.
    for h in range(HEADS):
        qh = fused[:, :, h * DIM_HEAD:(h + 1) * DIM_HEAD]                  # (B,N,Dh), scale folded in
        kh = fused[:, :, INNER + h * DIM_HEAD:INNER + (h + 1) * DIM_HEAD]  # (B,N,Dh)
        vh = fused[:, :, F_QK + h * DIM:F_QK + (h + 1) * DIM]              # (B,N,DIM) = x @ (Wv_h@Wo_h)

        s = jnp.einsum('bik,bjk->bij', qh, kh,
                       preferred_element_type=jnp.float32)                # (B,N,N)
        s = s - jnp.max(s, axis=-1, keepdims=True)
        e = jnp.exp(s)
        attn = e / jnp.sum(e, axis=-1, keepdims=True)                     # exact divide: f32 parity

        acc = acc + jnp.einsum('bij,bje->bie', attn, vh,
                               preferred_element_type=jnp.float32)        # merge heads by summation

    # Dropout is identity in eval mode.
    o_ref[...] = acc + bout_ref[...]


def prepare_weights(w_qkv, w_out):
    """One-time weight layout; call at init, NOT per forward call."""
    w_q = w_qkv[:, 0 * INNER:1 * INNER] * SCALE                        # fold attention scale into Wq
    w_k = w_qkv[:, 1 * INNER:2 * INNER]
    w_v = w_qkv[:, 2 * INNER:3 * INNER].reshape(DIM, HEADS, DIM_HEAD)  # (DIM, H, Dh)
    w_o = w_out.reshape(HEADS, DIM_HEAD, DIM)                          # (H, Dh, DIM)
    # Fold the output projection into the value projection (per head):
    #   Wvo[d, h, e] = sum_k Wv[d, h, k] * Wo[h, k, e]
    w_vo = jnp.einsum('dhk,hke->dhe', w_v, w_o).reshape(DIM, HEADS * DIM)
    return jnp.concatenate([w_q, w_k, w_vo], axis=1)                   # (DIM, F_TOTAL) = (32, 256)


def attention_forward(x, w_fused, b_out):
    assert x.shape == (B, N, DIM)
    assert w_fused.shape == (DIM, F_TOTAL)
    return pl.pallas_call(
        attention_kernel,
        out_shape=jax.ShapeDtypeStruct((B, N, DIM), jnp.float32),
        grid_spec=pltpu.PrefetchScalarGridSpec(
            num_scalar_prefetch=0,
            grid=(1,),
            in_specs=[
                pl.BlockSpec((B, N, DIM), lambda s: (0, 0, 0)),
                pl.BlockSpec((DIM, F_TOTAL), lambda s: (0, 0)),
                pl.BlockSpec((1, DIM), lambda s: (0, 0)),
            ],
            out_specs=pl.BlockSpec((B, N, DIM), lambda s: (0, 0, 0)),
        ),
        compiler_params=pltpu.CompilerParams(
            dimension_semantics=("arbitrary",)),
    )(x, w_fused, b_out)


def reference_forward(x, w_qkv, w_out, b_out):
    """Pure-JAX reference matching the PyTorch module (mask=None, eval)."""
    qkv = x @ w_qkv                                            # (B, N, 3*INNER)
    q, k, v = jnp.split(qkv, 3, axis=-1)

    def split_heads(t):                                        # b n (h d) -> b h n d
        return t.reshape(B, N, HEADS, DIM_HEAD).transpose(0, 2, 1, 3)

    q, k, v = map(split_heads, (q, k, v))
    dots = jnp.einsum('bhid,bhjd->bhij', q, k) * SCALE
    attn = jax.nn.softmax(dots, axis=-1)
    out = jnp.einsum('bhij,bhjd->bhid', attn, v)
    out = out.transpose(0, 2, 1, 3).reshape(B, N, INNER)       # b h n d -> b n (h d)
    return out @ w_out + b_out


if __name__ == "__main__":
    key = jax.random.PRNGKey(0)
    kx, kq, kw, kb = jax.random.split(key, 4)

    x = jax.random.normal(kx, (B, N, DIM), dtype=jnp.float32)
    w_qkv = jax.random.normal(kq, (DIM, 3 * INNER), dtype=jnp.float32) * 0.05
    w_out = jax.random.normal(kw, (INNER, DIM), dtype=jnp.float32) * 0.05
    b_out = jax.random.normal(kb, (1, DIM), dtype=jnp.float32) * 0.05

    # Weight layout done once at init (hoisted out of the per-call path).
    w_fused = jax.block_until_ready(prepare_weights(w_qkv, w_out))

    out = jax.block_until_ready(attention_forward(x, w_fused, b_out))
    ref = reference_forward(x, w_qkv, w_out, b_out)

    assert out.shape == (B, N, DIM)
    # Everything is exact f32 math; the only deviation from the reference is the
    # (Wv@Wo) / scale-into-Wq reassociation, which is far below this tolerance.
    assert jnp.allclose(out, ref, atol=1e-4, rtol=1e-4), "mismatch vs reference"

    print("KERNEL_OK")
</pallas_src>

<mosaic_0001>
module attributes {stable_mosaic.version = 11 : i64} {
  func.func @attention_kernel(%arg0: i32, %arg1: memref<2x8x32xf32, #tpu.memory_space<vmem>>, %arg2: memref<32x256xf32, #tpu.memory_space<vmem>>, %arg3: memref<1x32xf32, #tpu.memory_space<vmem>>, %arg4: memref<2x8x32xf32, #tpu.memory_space<vmem>>) attributes {dimension_semantics = [#tpu.dimension_semantics<arbitrary>], iteration_bounds = array<i64: 1>, scalar_prefetch = 0 : i64, scratch_operands = 0 : i64, tpu.core_type = #tpu.core_type<tc>, window_params = [{pipeline_mode = #tpu.pipeline_mode<synchronous>, transform_indices = @transform_0, window_bounds = array<i64: 2, 8, 32>}, {pipeline_mode = #tpu.pipeline_mode<synchronous>, transform_indices = @transform_1, window_bounds = array<i64: 32, 256>}, {pipeline_mode = #tpu.pipeline_mode<synchronous>, transform_indices = @transform_2, window_bounds = array<i64: 1, 32>}, {pipeline_mode = #tpu.pipeline_mode<synchronous>, transform_indices = @transform_3, window_bounds = array<i64: 2, 8, 32>}]} {
    %c0 = arith.constant 0 : index
    %c0_0 = arith.constant 0 : index
    %c0_1 = arith.constant 0 : index
    %0 = vector.load %arg1[%c0, %c0_0, %c0_1] : memref<2x8x32xf32, #tpu.memory_space<vmem>>, vector<2x8x32xf32>
    %1 = vector.shape_cast %0 : vector<2x8x32xf32> to vector<16x32xf32>
    %c0_2 = arith.constant 0 : index
    %c0_3 = arith.constant 0 : index
    %2 = vector.load %arg2[%c0_2, %c0_3] : memref<32x256xf32, #tpu.memory_space<vmem>>, vector<32x256xf32>
    %cst = arith.constant dense<0.000000e+00> : vector<16x256xf32>
    %3 = tpu.matmul %1, %2, %cst {dimension_numbers = #tpu.dot_dimension_numbers<[1], [0], [0], [1], [0, 0, 1, 1], [], []>} : vector<16x32xf32>, vector<32x256xf32>, vector<16x256xf32> -> vector<16x256xf32>
    %4 = vector.shape_cast %3 : vector<16x256xf32> to vector<2x8x256xf32>
    %cst_4 = arith.constant 0.000000e+00 : f32
    %5 = vector.broadcast %cst_4 : f32 to vector<2x8x32xf32>
    %6 = vector.extract_strided_slice %4 {offsets = [0, 0, 0], sizes = [2, 8, 16], strides = [1, 1, 1]} : vector<2x8x256xf32> to vector<2x8x16xf32>
    %7 = vector.extract_strided_slice %4 {offsets = [0, 0, 64], sizes = [2, 8, 16], strides = [1, 1, 1]} : vector<2x8x256xf32> to vector<2x8x16xf32>
    %8 = vector.extract_strided_slice %4 {offsets = [0, 0, 128], sizes = [2, 8, 32], strides = [1, 1, 1]} : vector<2x8x256xf32> to vector<2x8x32xf32>
    "tpu.trace_start"() <{level = 10 : i32, message = "bik,bjk->bij"}> : () -> ()
    %cst_5 = arith.constant dense<0.000000e+00> : vector<2x8x8xf32>
    %9 = tpu.matmul %6, %7, %cst_5 {dimension_numbers = #tpu.dot_dimension_numbers<[2], [2], [1], [1], [0, 0, 0, 1, 1, 1], [0], [0]>} : vector<2x8x16xf32>, vector<2x8x16xf32>, vector<2x8x8xf32> -> vector<2x8x8xf32>
    "tpu.trace_stop"() : () -> ()
    %cst_6 = arith.constant dense<0xFF800000> : vector<2x8xf32>
    %10 = vector.multi_reduction <maximumf>, %9, %cst_6 [2] : vector<2x8x8xf32> to vector<2x8xf32>
    %11 = vector.shape_cast %10 : vector<2x8xf32> to vector<2x8x1xf32>
    %12 = vector.broadcast %11 : vector<2x8x1xf32> to vector<2x8x8xf32>
    %13 = arith.subf %9, %12 : vector<2x8x8xf32>
    %14 = math.exp %13 : vector<2x8x8xf32>
    %cst_7 = arith.constant dense<0.000000e+00> : vector<2x8xf32>
    %15 = vector.multi_reduction <add>, %14, %cst_7 [2] : vector<2x8x8xf32> to vector<2x8xf32>
    %16 = vector.shape_cast %15 : vector<2x8xf32> to vector<2x8x1xf32>
    %17 = vector.broadcast %16 : vector<2x8x1xf32> to vector<2x8x8xf32>
    %18 = arith.divf %14, %17 : vector<2x8x8xf32>
    "tpu.trace_start"() <{level = 10 : i32, message = "bij,bje->bie"}> : () -> ()
    %cst_8 = arith.constant dense<0.000000e+00> : vector<2x8x32xf32>
    %19 = tpu.matmul %18, %8, %cst_8 {dimension_numbers = #tpu.dot_dimension_numbers<[2], [1], [1], [2], [0, 0, 0, 1, 1, 2], [0], [0]>} : vector<2x8x8xf32>, vector<2x8x32xf32>, vector<2x8x32xf32> -> vector<2x8x32xf32>
    "tpu.trace_stop"() : () -> ()
    %20 = arith.addf %5, %19 : vector<2x8x32xf32>
    %21 = vector.extract_strided_slice %4 {offsets = [0, 0, 16], sizes = [2, 8, 16], strides = [1, 1, 1]} : vector<2x8x256xf32> to vector<2x8x16xf32>
    %22 = vector.extract_strided_slice %4 {offsets = [0, 0, 80], sizes = [2, 8, 16], strides = [1, 1, 1]} : vector<2x8x256xf32> to vector<2x8x16xf32>
    %23 = vector.extract_strided_slice %4 {offsets = [0, 0, 160], sizes = [2, 8, 32], strides = [1, 1, 1]} : vector<2x8x256xf32> to vector<2x8x32xf32>
    "tpu.trace_start"() <{level = 10 : i32, message = "bik,bjk->bij"}> : () -> ()
    %cst_9 = arith.constant dense<0.000000e+00> : vector<2x8x8xf32>
    %24 = tpu.matmul %21, %22, %cst_9 {dimension_numbers = #tpu.dot_dimension_numbers<[2], [2], [1], [1], [0, 0, 0, 1, 1, 1], [0], [0]>} : vector<2x8x16xf32>, vector<2x8x16xf32>, vector<2x8x8xf32> -> vector<2x8x8xf32>
    "tpu.trace_stop"() : () -> ()
    %cst_10 = arith.constant dense<0xFF800000> : vector<2x8xf32>
    %25 = vector.multi_reduction <maximumf>, %24, %cst_10 [2] : vector<2x8x8xf32> to vector<2x8xf32>
    %26 = vector.shape_cast %25 : vector<2x8xf32> to vector<2x8x1xf32>
    %27 = vector.broadcast %26 : vector<2x8x1xf32> to vector<2x8x8xf32>
    %28 = arith.subf %24, %27 : vector<2x8x8xf32>
    %29 = math.exp %28 : vector<2x8x8xf32>
    %cst_11 = arith.constant dense<0.000000e+00> : vector<2x8xf32>
    %30 = vector.multi_reduction <add>, %29, %cst_11 [2] : vector<2x8x8xf32> to vector<2x8xf32>
    %31 = vector.shape_cast %30 : vector<2x8xf32> to vector<2x8x1xf32>
    %32 = vector.broadcast %31 : vector<2x8x1xf32> to vector<2x8x8xf32>
    %33 = arith.divf %29, %32 : vector<2x8x8xf32>
    "tpu.trace_start"() <{level = 10 : i32, message = "bij,bje->bie"}> : () -> ()
    %cst_12 = arith.constant dense<0.000000e+00> : vector<2x8x32xf32>
    %34 = tpu.matmul %33, %23, %cst_12 {dimension_numbers = #tpu.dot_dimension_numbers<[2], [1], [1], [2], [0, 0, 0, 1, 1, 2], [0], [0]>} : vector<2x8x8xf32>, vector<2x8x32xf32>, vector<2x8x32xf32> -> vector<2x8x32xf32>
    "tpu.trace_stop"() : () -> ()
    %35 = arith.addf %20, %34 : vector<2x8x32xf32>
    %36 = vector.extract_strided_slice %4 {offsets = [0, 0, 32], sizes = [2, 8, 16], strides = [1, 1, 1]} : vector<2x8x256xf32> to vector<2x8x16xf32>
    %37 = vector.extract_strided_slice %4 {offsets = [0, 0, 96], sizes = [2, 8, 16], strides = [1, 1, 1]} : vector<2x8x256xf32> to vector<2x8x16xf32>
    %38 = vector.extract_strided_slice %4 {offsets = [0, 0, 192], sizes = [2, 8, 32], strides = [1, 1, 1]} : vector<2x8x256xf32> to vector<2x8x32xf32>
    "tpu.trace_start"() <{level = 10 : i32, message = "bik,bjk->bij"}> : () -> ()
    %cst_13 = arith.constant dense<0.000000e+00> : vector<2x8x8xf32>
    %39 = tpu.matmul %36, %37, %cst_13 {dimension_numbers = #tpu.dot_dimension_numbers<[2], [2], [1], [1], [0, 0, 0, 1, 1, 1], [0], [0]>} : vector<2x8x16xf32>, vector<2x8x16xf32>, vector<2x8x8xf32> -> vector<2x8x8xf32>
    "tpu.trace_stop"() : () -> ()
    %cst_14 = arith.constant dense<0xFF800000> : vector<2x8xf32>
    %40 = vector.multi_reduction <maximumf>, %39, %cst_14 [2] : vector<2x8x8xf32> to vector<2x8xf32>
    %41 = vector.shape_cast %40 : vector<2x8xf32> to vector<2x8x1xf32>
    %42 = vector.broadcast %41 : vector<2x8x1xf32> to vector<2x8x8xf32>
    %43 = arith.subf %39, %42 : vector<2x8x8xf32>
    %44 = math.exp %43 : vector<2x8x8xf32>
    %cst_15 = arith.constant dense<0.000000e+00> : vector<2x8xf32>
    %45 = vector.multi_reduction <add>, %44, %cst_15 [2] : vector<2x8x8xf32> to vector<2x8xf32>
    %46 = vector.shape_cast %45 : vector<2x8xf32> to vector<2x8x1xf32>
    %47 = vector.broadcast %46 : vector<2x8x1xf32> to vector<2x8x8xf32>
    %48 = arith.divf %44, %47 : vector<2x8x8xf32>
    "tpu.trace_start"() <{level = 10 : i32, message = "bij,bje->bie"}> : () -> ()
    %cst_16 = arith.constant dense<0.000000e+00> : vector<2x8x32xf32>
    %49 = tpu.matmul %48, %38, %cst_16 {dimension_numbers = #tpu.dot_dimension_numbers<[2], [1], [1], [2], [0, 0, 0, 1, 1, 2], [0], [0]>} : vector<2x8x8xf32>, vector<2x8x32xf32>, vector<2x8x32xf32> -> vector<2x8x32xf32>
    "tpu.trace_stop"() : () -> ()
    %50 = arith.addf %35, %49 : vector<2x8x32xf32>
    %51 = vector.extract_strided_slice %4 {offsets = [0, 0, 48], sizes = [2, 8, 16], strides = [1, 1, 1]} : vector<2x8x256xf32> to vector<2x8x16xf32>
    %52 = vector.extract_strided_slice %4 {offsets = [0, 0, 112], sizes = [2, 8, 16], strides = [1, 1, 1]} : vector<2x8x256xf32> to vector<2x8x16xf32>
    %53 = vector.extract_strided_slice %4 {offsets = [0, 0, 224], sizes = [2, 8, 32], strides = [1, 1, 1]} : vector<2x8x256xf32> to vector<2x8x32xf32>
    "tpu.trace_start"() <{level = 10 : i32, message = "bik,bjk->bij"}> : () -> ()
    %cst_17 = arith.constant dense<0.000000e+00> : vector<2x8x8xf32>
    %54 = tpu.matmul %51, %52, %cst_17 {dimension_numbers = #tpu.dot_dimension_numbers<[2], [2], [1], [1], [0, 0, 0, 1, 1, 1], [0], [0]>} : vector<2x8x16xf32>, vector<2x8x16xf32>, vector<2x8x8xf32> -> vector<2x8x8xf32>
    "tpu.trace_stop"() : () -> ()
    %cst_18 = arith.constant dense<0xFF800000> : vector<2x8xf32>
    %55 = vector.multi_reduction <maximumf>, %54, %cst_18 [2] : vector<2x8x8xf32> to vector<2x8xf32>
    %56 = vector.shape_cast %55 : vector<2x8xf32> to vector<2x8x1xf32>
    %57 = vector.broadcast %56 : vector<2x8x1xf32> to vector<2x8x8xf32>
    %58 = arith.subf %54, %57 : vector<2x8x8xf32>
    %59 = math.exp %58 : vector<2x8x8xf32>
    %cst_19 = arith.constant dense<0.000000e+00> : vector<2x8xf32>
    %60 = vector.multi_reduction <add>, %59, %cst_19 [2] : vector<2x8x8xf32> to vector<2x8xf32>
    %61 = vector.shape_cast %60 : vector<2x8xf32> to vector<2x8x1xf32>
    %62 = vector.broadcast %61 : vector<2x8x1xf32> to vector<2x8x8xf32>
    %63 = arith.divf %59, %62 : vector<2x8x8xf32>
    "tpu.trace_start"() <{level = 10 : i32, message = "bij,bje->bie"}> : () -> ()
    %cst_20 = arith.constant dense<0.000000e+00> : vector<2x8x32xf32>
    %64 = tpu.matmul %63, %53, %cst_20 {dimension_numbers = #tpu.dot_dimension_numbers<[2], [1], [1], [2], [0, 0, 0, 1, 1, 2], [0], [0]>} : vector<2x8x8xf32>, vector<2x8x32xf32>, vector<2x8x32xf32> -> vector<2x8x32xf32>
    "tpu.trace_stop"() : () -> ()
    %65 = arith.addf %50, %64 : vector<2x8x32xf32>
    %c0_21 = arith.constant 0 : index
    %c0_22 = arith.constant 0 : index
    %66 = vector.load %arg3[%c0_21, %c0_22] : memref<1x32xf32, #tpu.memory_space<vmem>>, vector<1x32xf32>
    %67 = vector.shape_cast %66 : vector<1x32xf32> to vector<1x1x32xf32>
    %68 = vector.broadcast %67 : vector<1x1x32xf32> to vector<2x8x32xf32>
    %69 = arith.addf %65, %68 : vector<2x8x32xf32>
    %c0_23 = arith.constant 0 : index
    %c0_24 = arith.constant 0 : index
    %c0_25 = arith.constant 0 : index
    %70 = vector.load %arg4[%c0_23, %c0_24, %c0_25] : memref<2x8x32xf32, #tpu.memory_space<vmem>>, vector<2x8x32xf32>
    tpu.vector_store %arg4[%c0_23, %c0_24, %c0_25], %69 {strides = array<i32>} : memref<2x8x32xf32, #tpu.memory_space<vmem>>, vector<2x8x32xf32>,
    return
  }
  func.func @transform_0(%arg0: i32) -> (i32, i32, i32) {
    %c0_i32 = arith.constant 0 : i32
    %c0_i32_0 = arith.constant 0 : i32
    %c0_i32_1 = arith.constant 0 : i32
    %c0_i32_2 = arith.constant 0 : i32
    return %c0_i32, %c0_i32_0, %c0_i32_1 : i32, i32, i32
  }
  func.func @transform_1(%arg0: i32) -> (i32, i32) {
    %c0_i32 = arith.constant 0 : i32
    %c0_i32_0 = arith.constant 0 : i32
    %c0_i32_1 = arith.constant 0 : i32
    return %c0_i32, %c0_i32_0 : i32, i32
  }
  func.func @transform_2(%arg0: i32) -> (i32, i32) {
    %c0_i32 = arith.constant 0 : i32
    %c0_i32_0 = arith.constant 0 : i32
    %c0_i32_1 = arith.constant 0 : i32
    return %c0_i32, %c0_i32_0 : i32, i32
  }
  func.func @transform_3(%arg0: i32) -> (i32, i32, i32) {
    %c0_i32 = arith.constant 0 : i32
    %c0_i32_0 = arith.constant 0 : i32
    %c0_i32_1 = arith.constant 0 : i32
    %c0_i32_2 = arith.constant 0 : i32
    return %c0_i32, %c0_i32_0, %c0_i32_1 : i32, i32, i32
  }
}

</mosaic_0001>

<bundles_post_ra>
// kernel: tpu_custom_call.1
= control target key start
LH: loop header
LB: loop body
LE: loop exit
PB: predicated region body
PF: predicated region fallthrough
CT: control target
= control target key end

     0   :  { %8 = vsyncpa [#allocation3], 0  ;;  %s1938_s0 = inlined_call_operand.hbm [shape: f32[2,8,32], index: 0, kind: input, shape index: {}]   ;;  %s1939_s1 = inlined_call_operand.hbm [shape: f32[32,256], index: 1, kind: input, shape index: {}]   ;;  %s1940_s2 = inlined_call_operand.vmem [shape: f32[1,32], index: 2, kind: input, shape index: {}]   ;;  %s1941_s3 = inlined_call_operand.hbm [shape: f32[2,8,32], index: 3, kind: output, shape index: {}]  }
   0x1   :  { %9 = vsyncpa [#allocation6], 0 }
   0x2   :  { %10 = vsyncpa [#allocation4], 0  ;;  %s1738_s12 = smov [#allocation2]  }
   0x3   :  { %s16_s13 = sshll.u32 %s1738_s12, 4  ;;  %s17_s13 = int_to_ptr.vmem [resolvable:$true] %s16_s13 }
   0x4   :  { %s1680_s14 = scalar_lea.vmem %s17_s13, 256  ;;  %p1685_p1 = scmp.lt.s32.totalorder %s17_s13, %s17_s13 }
   0x5   :  { %p1681_p0 = scmp.ne.s32.totalorder %s17_s13, %s1680_s14  ;;  %p1686_p2 = scmp.lt.s32.totalorder %s1680_s14, %s1680_s14 }
   0x7   :  { %p1687_p3 = por %p1686_p2, %p1685_p1 }
   0x9   :  { %p1688_p4 = pnand %p1687_p3, %p1681_p0 }
   0xb   :  { %1691 = shalt.err (!%p1688_p4)
}
   0xc   :  { %s1739_s15 = smov 128   ;;  %s1740_s16 = smov 8  }
   0xd   :  { %22 = dma.hbm_to_vmem [thread:$0]  %s1938_s0, 256, %s17_s13, [#allocation3], %s1739_s15, %s1739_s15, %s1740_s16  }
   0xe   :  { %s1741_s19 = smov [#allocation5]  }
   0xf   :  { %s28_s20 = sshll.u32 %s1741_s19, 4  ;;  %s29_s20 = int_to_ptr.vmem [resolvable:$true] %s28_s20 }
  0x10   :  { %s1700_s21 = scalar_lea.vmem %s29_s20, 1024  ;;  %p1705_p6 = scmp.lt.s32.totalorder %s29_s20, %s29_s20 }
  0x11   :  { %p1701_p5 = scmp.ne.s32.totalorder %s29_s20, %s1700_s21  ;;  %p1706_p7 = scmp.lt.s32.totalorder %s1700_s21, %s1700_s21 }
  0x13   :  { %p1707_p8 = por %p1706_p7, %p1705_p6 }
  0x15   :  { %p1708_p9 = pnand %p1707_p8, %p1701_p5 }
  0x17   :  { %1711 = shalt.err (!%p1708_p9)
}
  0x18   :  { %s1742_s22 = smov 256   ;;  %s1743_s23 = smov 16  }
  0x19   :  { %34 = dma.hbm_to_vmem [thread:$0]  %s1939_s1, 1024, %s29_s20, [#allocation6], %s1742_s22, %s1742_s22, %s1743_s23  }
  0x1a   :  { %1732 = dma.done.wait [#allocation3], 256  }
  0x1b   :  { %1733 = vsyncadd [#allocation3], 4294967040 }
  0x1c   :  { %1734 = dma.done.wait [#allocation6], 1024  }
  0x1d   :  { %1735 = vsyncadd [#allocation6], 4294966272  ;;  %v1744_v0 = vmov 0.0   ;;  %v52_v1 = vld [vmem:[#allocation5 + $0x38] sm:$0xff]  ;;  %v51_v2 = vld [vmem:[#allocation5 + $0x30] sm:$0xff]  ;;  %vm53_vm0 = vcmask 261120  }
  0x1e   :  { %124 = vmatprep.mubr.f32.mxu0 %v1744_v0  ;;  %1545 = vmatprep.subr.mxu1 %v1744_v0  ;;  %v50_v3 = vld [vmem:[#allocation5 + $0x28] sm:$0xff]  ;;  %v49_v4 = vld [vmem:[#allocation5 + $0x20] sm:$0xff]  ;;  %v48_v5 = vld [vmem:[#allocation5 + $0x18] sm:$0xff]  ;;  %vm1745_vm1 = vmmov 0   ;;  %s1746_s0 = smov 48   ;;  %s1747_s1 = smov 64  }
  0x1f   :  { %84 = vmatprep.subr.mxu0 %v52_v1  ;;  %v47_v6 = vld [vmem:[#allocation5 + $0x10] sm:$0xff]  ;;  %v46_v7 = vld [vmem:[#allocation5 + $0x8] sm:$0xff]  ;;  %v45_v8 = vld [vmem:[#allocation5] sm:$0xff]  ;;  %1547 = vmatprep.mubr.msk.f32.mxu1 %vm1745_vm1, %v1744_v0  ;;  %s1748_s26 = smov 112   ;;  %vm140_vm2 = vcmask 130048   ;;  %vm292_vm3 = vcmask 64512  }
  0x20   :  { %85 = vmatpush1.msra.mxu0 %v51_v2  ;;  %v43_v9 = vld [vmem:[#allocation2] sm:$0xff]  ;;  %v44_v10 = vld [vmem:[#allocation2 + $0x8] sm:$0xff]  ;;  %s1749_s27 = smov 96   ;;  %s1750_s28 = smov 32  }
  0x21   :  { %86 = vmatprep.subr.mxu0 %v50_v3  ;;  %s1751_s29 = smov 80   ;;  %s1752_s5 = smov [#allocation7]  }
  0x22   :  { %87 = vmatpush1.msra.mxu0 %v49_v4  ;;  %s1473_s6 = sshll.u32 %s1752_s5, 4  ;;  %s1474_s6 = int_to_ptr.vmem [resolvable:$true] %s1473_s6 }
  0x23   :  { %88 = vmatprep.subr.mxu0 %v48_v5  ;;  %s1712_s7 = scalar_lea.vmem %s1474_s6, 256  ;;  %p1717_p11 = scmp.lt.s32.totalorder %s1474_s6, %s1474_s6 }
  0x24   :  { %89 = vmatpush1.msra.mxu0 %v47_v6  ;;  %p1713_p10 = scmp.ne.s32.totalorder %s1474_s6, %s1712_s7  ;;  %p1718_p12 = scmp.lt.s32.totalorder %s1712_s7, %s1712_s7 }
  0x25   :  { %90 = vmatprep.subr.mxu0 %v46_v7 }
  0x26   :  { %91 = vmatpush1.msra.mxu0 %v45_v8  ;;  %p1719_p13 = por %p1718_p12, %p1717_p11 }
  0x27   :  { %1486 = vmatmul.mubr.msk.f32.vlgmr.msra.gmra.mxu0 %vm53_vm0, %v43_v9  ;;  %1560 = vmatprep.subr.mxu0 %v1744_v0 }
  0x28   :  { %130 = vmatprep.mubr.f32.mxu0 %v1744_v0  ;;  %p1720_p0 = pnand %p1719_p13, %p1713_p10 }
  0x2b   :  { %1487 = vmatmul.mubr.msk.f32.gmra.mxu0 %vm53_vm0, %v44_v10 }
  0x2c   :  { %1562 = vmatprep.mubr.msk.f32.mxu0 %vm1745_vm1, %v1744_v0 }
  0xe7   :  { %v1793_v11 = vpop.f32.mrf.mxu0 }
  0xe8   :  { %317 = vrot.lane.b32.xlu1 %v1793_v11, %s1746_s0  ;;  %138 = vrot.lane.b32.xlu0 %v1793_v11, %s1747_s1 }
  0xe9   :  { %v1798_v12 = vpop.f32.mrf.mxu0 }
  0xeb   :  { %v1800_v13 = vpop.f32.mrf.mxu0 }
  0xec   :  { %395 = vrot.lane.b32.xlu1 %v1800_v13, %s1746_s0  ;;  %216 = vrot.lane.b32.xlu0 %v1800_v13, %s1747_s1 }
  0xed   :  { %v1830_v23 = vpop.f32.mrf.mxu0 }
  0xf0   :  { %393 = vrot.lane.b32.xlu1 %v1800_v13, %s1748_s26  ;;  %315 = vrot.lane.b32.xlu0 %v1793_v11, %s1748_s26 }
 0x15a   :  { %v318_v14 = vpop.permute.xlu1 %317  ;;  %v139_v15 = vpop.permute.xlu0 %138 }
 0x15b   :  { %1546 = vmatpush3.xpose.msk.msra.mxu1 %vm140_vm2, %v139_v15 }
 0x15c   :  { %1550 = vmatprep.subr.mxu1 %v1744_v0 }
 0x15e   :  { %1548 = vmatmul.mubr.msk.f32.vlgmr.msra.gmra.mxu1 %vm140_vm2, %v1793_v11  ;;  %v396_v16 = vpop.permute.xlu1 %395  ;;  %v217_v17 = vpop.permute.xlu0 %216 }
 0x15f   :  { %1551 = vmatpush3.xpose.msk.msra.mxu1 %vm140_vm2, %v217_v17  ;;  %1561 = vmatpush3.xpose.msk.msra.mxu0 %vm140_vm2, %v396_v16 }
 0x160   :  { %1552 = vmatprep.mubr.msk.f32.mxu1 %vm1745_vm1, %v1744_v0  ;;  %1555 = vmatprep.subr.mxu1 %v1744_v0 }
 0x161   :  { %1570 = vmatprep.subr.mxu0 %v1744_v0 }
 0x162   :  { %v394_v18 = vpop.permute.xlu1 %393  ;;  %1553 = vmatmul.mubr.msk.f32.vlgmr.msra.gmra.mxu1 %vm140_vm2, %v1800_v13  ;;  %v316_v19 = vpop.permute.xlu0 %315 }
 0x163   :  { %1556 = vmatpush3.xpose.msk.msra.mxu1 %vm140_vm2, %v318_v14  ;;  %1563 = vmatmul.mubr.msk.f32.vlgmr.msra.gmra.mxu0 %vm140_vm2, %v394_v18 }
 0x164   :  { %1557 = vmatprep.mubr.msk.f32.mxu1 %vm1745_vm1, %v1744_v0  ;;  %1565 = vmatprep.subr.mxu1 %v1744_v0 }
 0x165   :  { %1572 = vmatprep.mubr.msk.f32.mxu0 %vm1745_vm1, %v1744_v0 }
 0x166   :  { %1558 = vmatmul.mubr.msk.f32.vlgmr.msra.gmra.mxu1 %vm140_vm2, %v316_v19 }
 0x167   :  { %1567 = vmatprep.mubr.msk.f32.mxu1 %vm1745_vm1, %v1744_v0 }
 0x21e   :  { %v211_v20 = vpop.f32.mrf.mxu1 }
 0x21f   :  { %v293_v21 = vsel %vm292_vm3, %v211_v20, -inf }
 0x220   :  { %v1549_v22 = vpop.f32.mrf.mxu1  ;;  %294 = vmax.xlane.f32.xlu0 %v293_v21 }
 0x222   :  { %v288_v24 = vpop.f32.mrf.mxu1 }
 0x223   :  { %v467_v25 = vpop.f32.mrf.mxu0  ;;  %v296_v32 = vsel %vm292_vm3, %v288_v24, -inf }
 0x224   :  { %v1554_v26 = vpop.f32.mrf.mxu1  ;;  %v474_v27 = vsel %vm292_vm3, %v467_v25, -inf }
 0x225   :  { %475 = vmax.xlane.f32.xlu1 %v474_v27  ;;  %v1564_v28 = vpop.f32.mrf.mxu0 }
 0x226   :  { %v389_v29 = vpop.f32.mrf.mxu1 }
 0x227   :  { %v471_v30 = vsel %vm292_vm3, %v389_v29, -inf }
 0x228   :  { %472 = vmax.xlane.f32.xlu0 %v471_v30  ;;  %v1559_v31 = vpop.f32.mrf.mxu1 }
 0x22c   :  { %297 = vmax.xlane.f32.xlu0 %v296_v32 }
 0x236   :  { %494 = vrot.lane.b32.xlu1 %v1798_v12, %s1749_s27 }
 0x2a9   :  { %v295_v33 = vpop.xlane.xlu0 %294 }
 0x2aa   :  { %v299_v34 = vsub.f32 %v211_v20, %v295_v33 }
 0x2ac   :  { %v301_v35 = vmul.f32 1.442695, %v299_v34 }
 0x2ae   :  { %1640 = vpow2.f32 %v301_v35  ;;  %v476_v36 = vpop.xlane.xlu1 %475 }
 0x2af   :  { %v478_v37 = vsub.f32 %v467_v25, %v476_v36 }
 0x2b1   :  { %v481_v38 = vmul.f32 1.442695, %v478_v37  ;;  %v473_v39 = vpop.xlane.xlu0 %472 }
 0x2b2   :  { %v495_v40 = vpop.permute.xlu1 %494  ;;  %v477_v50 = vsub.f32 %v389_v29, %v473_v39 }
 0x2b3   :  { %1642 = vpow2.f32 %v481_v38  ;;  %1566 = vmatpush3.msra.mxu1 %v495_v40 }
 0x2b4   :  { %1575 = vmatprep.subr.mxu1 %v1744_v0  ;;  %v479_v51 = vmul.f32 1.442695, %v477_v50 }
 0x2b5   :  { %v298_v41 = vpop.xlane.xlu0 %297 }
 0x2b6   :  { %v300_v42 = vsub.f32 %v288_v24, %v298_v41 }
 0x2b8   :  { %v303_v43 = vmul.f32 1.442695, %v300_v42 }
 0x2ba   :  { %1644 = vpow2.f32 %v303_v43 }
 0x2bb   :  { %v1641_v44 = vpop.eup %1640  ;;  %1646 = vpow2.f32 %v479_v51 }
 0x2bc   :  { %v305_v45 = vsel %vm292_vm3, %v1641_v44, 0.0 }
 0x2bd   :  { %306 = vadd.xlane.f32.xlu1 %v305_v45 }
 0x2c0   :  { %v1643_v46 = vpop.eup %1642 }
 0x2c1   :  { %v486_v47 = vsel %vm292_vm3, %v1643_v46, 0.0 }
 0x2c2   :  { %487 = vadd.xlane.f32.xlu0 %v486_v47 }
 0x2c7   :  { %v1645_v48 = vpop.eup %1644 }
 0x2c8   :  { %v308_v49 = vsel %vm292_vm3, %v1645_v48, 0.0  ;;  %v1647_v52 = vpop.eup %1646 }
 0x2c9   :  { %309 = vadd.xlane.f32.xlu0 %v308_v49  ;;  %v483_v53 = vsel %vm292_vm3, %v1647_v52, 0.0 }
 0x2ce   :  { %795 = vrot.lane.b32.xlu1 %v1793_v11, %s1750_s28 }
 0x2d2   :  { %873 = vrot.lane.b32.xlu1 %v1800_v13, %s1750_s28 }
 0x2df   :  { %571 = vrot.lane.b32.xlu0 %v1830_v23, %s1749_s27 }
 0x2e3   :  { %793 = vrot.lane.b32.xlu0 %v1793_v11, %s1749_s27 }
 0x2f6   :  { %484 = vadd.xlane.f32.xlu1 %v483_v53 }
 0x307   :  { %871 = vrot.lane.b32.xlu1 %v1800_v13, %s1749_s27 }
 0x346   :  { %v307_v57 = vpop.xlane.xlu1 %306 }
 0x34a   :  { %v796_v60 = vpop.permute.xlu1 %795 }
 0x34b   :  { %v488_v54 = vpop.xlane.xlu0 %487 }
 0x34c   :  { %1648 = vrcp.f32 %v488_v54 }
 0x34e   :  { %v874_v63 = vpop.permute.xlu1 %873 }
 0x352   :  { %v310_v55 = vpop.xlane.xlu0 %309 }
 0x353   :  { %1650 = vrcp.f32 %v310_v55 }
 0x356   :  { %v572_v56 = vpop.permute.xlu0 %571 }
 0x357   :  { %1571 = vmatpush3.msra.mxu0 %v572_v56 }
 0x358   :  { %1580 = vmatprep.subr.mxu0 %v1744_v0 }
 0x359   :  { %v1649_v58 = vpop.eup %1648 }
 0x35a   :  { %v492_v59 = vmul.f32 %v1649_v58, %v1643_v46  ;;  %v794_v7 = vpop.permute.xlu0 %793 }
 0x35c   :  { %1573 = vmatmul.mubr.msk.f32.vlgmr.msra.gmra.mxu0 %vm292_vm3, %v492_v59 }
 0x35d   :  { %1581 = vmatpush3.msra.mxu0 %v1830_v23  ;;  %1582 = vmatprep.mubr.msk.f32.mxu0 %vm1745_vm1, %v1744_v0 }
 0x35e   :  { %1590 = vmatprep.subr.mxu0 %v1744_v0 }
 0x360   :  { %v1651_v61 = vpop.eup %1650 }
 0x361   :  { %v314_v62 = vmul.f32 %v1651_v61, %v1645_v48 }
 0x363   :  { %1583 = vmatmul.mubr.msk.f32.vlgmr.msra.gmra.mxu0 %vm292_vm3, %v314_v62 }
 0x364   :  { %1591 = vmatpush3.xpose.msk.msra.mxu0 %vm140_vm2, %v874_v63  ;;  %1592 = vmatprep.mubr.msk.f32.mxu0 %vm1745_vm1, %v1744_v0 }
 0x365   :  { %1600 = vmatprep.subr.mxu0 %v1744_v0 }
 0x37f   :  { %v485_v1 = vpop.xlane.xlu1 %484 }
 0x380   :  { %1652 = vrcp.f32 %v485_v1 }
 0x381   :  { %1654 = vrcp.f32 %v307_v57 }
 0x383   :  { %v872_v2 = vpop.permute.xlu1 %871 }
 0x384   :  { %1593 = vmatmul.mubr.msk.f32.vlgmr.msra.gmra.mxu0 %vm140_vm2, %v872_v2 }
 0x385   :  { %1602 = vmatprep.mubr.msk.f32.mxu0 %vm1745_vm1, %v1744_v0 }
 0x38d   :  { %v1653_v3 = vpop.eup %1652 }
 0x38e   :  { %v490_v4 = vmul.f32 %v1653_v3, %v1647_v52  ;;  %v1655_v5 = vpop.eup %1654 }
 0x38f   :  { %v312_v6 = vmul.f32 %v1655_v5, %v1641_v44 }
 0x390   :  { %1568 = vmatmul.mubr.msk.f32.vlgmr.msra.gmra.mxu1 %vm292_vm3, %v490_v4 }
 0x391   :  { %1576 = vmatpush3.msra.mxu1 %v1798_v12  ;;  %1577 = vmatprep.mubr.msk.f32.mxu1 %vm1745_vm1, %v1744_v0 }
 0x392   :  { %1585 = vmatprep.subr.mxu1 %v1744_v0 }
 0x394   :  { %1578 = vmatmul.mubr.msk.f32.vlgmr.msra.gmra.mxu1 %vm292_vm3, %v312_v6 }
 0x395   :  { %1586 = vmatpush3.xpose.msk.msra.mxu1 %vm140_vm2, %v796_v60  ;;  %1587 = vmatprep.mubr.msk.f32.mxu1 %vm1745_vm1, %v1744_v0 }
 0x396   :  { %1595 = vmatprep.subr.mxu1 %v1744_v0 }
 0x398   :  { %1588 = vmatmul.mubr.msk.f32.vlgmr.msra.gmra.mxu1 %vm140_vm2, %v794_v7 }
 0x399   :  { %1597 = vmatprep.mubr.msk.f32.mxu1 %vm1745_vm1, %v1744_v0 }
 0x41c   :  { %v643_v8 = vpop.f32.mrf.mxu0 }
 0x41e   :  { %v1574_v9 = vpop.f32.mrf.mxu0 }
 0x423   :  { %v789_v10 = vpop.f32.mrf.mxu0 }
 0x424   :  { %v1879_v14 = vadd.f32 %v789_v10, %v643_v8 }
 0x425   :  { %v1584_v15 = vpop.f32.mrf.mxu0 }
 0x444   :  { %v945_v16 = vpop.f32.mrf.mxu0 }
 0x445   :  { %v952_v17 = vsel %vm292_vm3, %v945_v16, -inf }
 0x446   :  { %953 = vmax.xlane.f32.xlu1 %v952_v17  ;;  %v1594_v18 = vpop.f32.mrf.mxu0  ;;  %v1512_v17 = vld [vmem:[%s1940_s2] ss:$0 sm:$0xff] }
 0x450   :  { %v566_v19 = vpop.f32.mrf.mxu1 }
 0x452   :  { %v1569_v20 = vpop.f32.mrf.mxu1 }
 0x454   :  { %v716_v21 = vpop.f32.mrf.mxu1 }
 0x455   :  { %v1882_v22 = vadd.f32 %v716_v21, %v566_v19 }
 0x456   :  { %v1579_v24 = vpop.f32.mrf.mxu1 }
 0x457   :  { %971 = vrot.lane.b32.xlu1 %v1798_v12, %s1747_s1 }
 0x458   :  { %v867_v25 = vpop.f32.mrf.mxu1 }
 0x459   :  { %v949_v26 = vsel %vm292_vm3, %v867_v25, -inf }
 0x45a   :  { %950 = vmax.xlane.f32.xlu0 %v949_v26  ;;  %v1589_v27 = vpop.f32.mrf.mxu1 }
 0x45b   :  { %1127 = vrot.lane.b32.xlu1 %v1793_v11, %s1743_s23 }
 0x45f   :  { %1205 = vrot.lane.b32.xlu1 %v1800_v13, %s1743_s23 }
 0x463   :  { %1203 = vrot.lane.b32.xlu1 %v1800_v13, %s1751_s29 }
 0x4cf   :  { %v954_v28 = vpop.xlane.xlu1 %953 }
 0x4d0   :  { %v956_v29 = vsub.f32 %v945_v16, %v954_v28 }
 0x4d2   :  { %v959_v30 = vmul.f32 1.442695, %v956_v29 }
 0x4d3   :  { %v972_v31 = vpop.permute.xlu1 %971 }
 0x4d4   :  { %1656 = vpow2.f32 %v959_v30  ;;  %1596 = vmatpush3.msra.mxu1 %v972_v31 }
 0x4d5   :  { %1605 = vmatprep.subr.mxu1 %v1744_v0 }
 0x4d7   :  { %v1128_v39 = vpop.permute.xlu1 %1127 }
 0x4db   :  { %v1206_v42 = vpop.permute.xlu1 %1205 }
 0x4e1   :  { %v1657_v32 = vpop.eup %1656 }
 0x4e2   :  { %v964_v33 = vsel %vm292_vm3, %v1657_v32, 0.0 }
 0x4e3   :  { %v951_v34 = vpop.xlane.xlu0 %950  ;;  %965 = vadd.xlane.f32.xlu0 %v964_v33 }
 0x4e4   :  { %v955_v35 = vsub.f32 %v867_v25, %v951_v34 }
 0x4e6   :  { %v957_v36 = vmul.f32 1.442695, %v955_v35 }
 0x4e8   :  { %1658 = vpow2.f32 %v957_v36 }
 0x4f5   :  { %v1659_v37 = vpop.eup %1658 }
 0x4f6   :  { %v961_v38 = vsel %vm292_vm3, %v1659_v37, 0.0 }
 0x4f7   :  { %962 = vadd.xlane.f32.xlu0 %v961_v38 }
 0x50d   :  { %1047 = vrot.lane.b32.xlu0 %v1830_v23, %s1747_s1 }
 0x511   :  { %1125 = vrot.lane.b32.xlu0 %v1793_v11, %s1751_s29  ;;  %v1204_v11 = vpop.permute.xlu1 %1203 }
 0x56c   :  { %v966_v13 = vpop.xlane.xlu0 %965 }
 0x56d   :  { %1660 = vrcp.f32 %v966_v13 }
 0x57a   :  { %v1661_v41 = vpop.eup %1660 }
 0x57b   :  { %v970_v44 = vmul.f32 %v1661_v41, %v1657_v32 }
 0x580   :  { %v963_v40 = vpop.xlane.xlu0 %962 }
 0x581   :  { %1662 = vrcp.f32 %v963_v40 }
 0x584   :  { %v1048_v43 = vpop.permute.xlu0 %1047 }
 0x585   :  { %1601 = vmatpush3.msra.mxu0 %v1048_v43 }
 0x586   :  { %1603 = vmatmul.mubr.msk.f32.vlgmr.msra.gmra.mxu0 %vm292_vm3, %v970_v44  ;;  %1610 = vmatprep.subr.mxu0 %v1744_v0 }
 0x587   :  { %1611 = vmatpush3.xpose.msk.msra.mxu0 %vm140_vm2, %v1206_v42  ;;  %1612 = vmatprep.mubr.msk.f32.mxu0 %vm1745_vm1, %v1744_v0 }
 0x588   :  { %1620 = vmatprep.subr.mxu0 %v1744_v0  ;;  %v1126_v47 = vpop.permute.xlu0 %1125 }
 0x58a   :  { %1613 = vmatmul.mubr.msk.f32.vlgmr.msra.gmra.mxu0 %vm140_vm2, %v1204_v11 }
 0x58b   :  { %1622 = vmatprep.mubr.msk.f32.mxu0 %vm1745_vm1, %v1744_v0 }
 0x58e   :  { %v1663_v45 = vpop.eup %1662 }
 0x58f   :  { %v968_v46 = vmul.f32 %v1663_v45, %v1659_v37 }
 0x591   :  { %1598 = vmatmul.mubr.msk.f32.vlgmr.msra.gmra.mxu1 %vm292_vm3, %v968_v46 }
 0x592   :  { %1606 = vmatpush3.xpose.msk.msra.mxu1 %vm140_vm2, %v1128_v39  ;;  %1607 = vmatprep.mubr.msk.f32.mxu1 %vm1745_vm1, %v1744_v0 }
 0x593   :  { %1615 = vmatprep.subr.mxu1 %v1744_v0 }
 0x595   :  { %1608 = vmatmul.mubr.msk.f32.vlgmr.msra.gmra.mxu1 %vm140_vm2, %v1126_v47 }
 0x596   :  { %1617 = vmatprep.mubr.msk.f32.mxu1 %vm1745_vm1, %v1744_v0 }
 0x646   :  { %v1119_v48 = vpop.f32.mrf.mxu0 }
 0x647   :  { %v1124_v49 = vadd.f32 %v1119_v48, %v1879_v14 }
 0x648   :  { %v1604_v50 = vpop.f32.mrf.mxu0 }
 0x64a   :  { %v1277_v51 = vpop.f32.mrf.mxu0 }
 0x64b   :  { %v1284_v52 = vsel %vm292_vm3, %v1277_v51, -inf }
 0x64c   :  { %1285 = vmax.xlane.f32.xlu1 %v1284_v52  ;;  %v1614_v53 = vpop.f32.mrf.mxu0 }
 0x651   :  { %v1043_v54 = vpop.f32.mrf.mxu1 }
 0x652   :  { %v1123_v55 = vadd.f32 %v1043_v54, %v1882_v22 }
 0x653   :  { %v1599_v56 = vpop.f32.mrf.mxu1 }
 0x655   :  { %v1199_v57 = vpop.f32.mrf.mxu1 }
 0x656   :  { %v1281_v58 = vsel %vm292_vm3, %v1199_v57, -inf }
 0x657   :  { %1282 = vmax.xlane.f32.xlu0 %v1281_v58  ;;  %v1609_v59 = vpop.f32.mrf.mxu1 }
 0x65d   :  { %1303 = vrot.lane.b32.xlu1 %v1798_v12, %s1750_s28 }
 0x6d5   :  { %v1286_v0 = vpop.xlane.xlu1 %1285 }
 0x6d6   :  { %v1288_v60 = vsub.f32 %v1277_v51, %v1286_v0 }
 0x6d8   :  { %v1291_v61 = vmul.f32 1.442695, %v1288_v60 }
 0x6d9   :  { %v1304_v62 = vpop.permute.xlu1 %1303 }
 0x6da   :  { %1664 = vpow2.f32 %v1291_v61  ;;  %1616 = vmatpush3.msra.mxu1 %v1304_v62 }
 0x6e0   :  { %v1283_v63 = vpop.xlane.xlu0 %1282 }
 0x6e1   :  { %v1287_v1 = vsub.f32 %v1199_v57, %v1283_v63 }
 0x6e3   :  { %v1289_v2 = vmul.f32 1.442695, %v1287_v1 }
 0x6e5   :  { %1666 = vpow2.f32 %v1289_v2 }
 0x6e7   :  { %v1665_v3 = vpop.eup %1664 }
 0x6e8   :  { %v1296_v4 = vsel %vm292_vm3, %v1665_v3, 0.0 }
 0x6e9   :  { %1297 = vadd.xlane.f32.xlu0 %v1296_v4 }
 0x6f2   :  { %v1667_v5 = vpop.eup %1666 }
 0x6f3   :  { %v1293_v6 = vsel %vm292_vm3, %v1667_v5, 0.0 }
 0x6f4   :  { %1294 = vadd.xlane.f32.xlu0 %v1293_v6 }
 0x70a   :  { %1379 = vrot.lane.b32.xlu0 %v1830_v23, %s1750_s28 }
 0x772   :  { %v1298_v12 = vpop.xlane.xlu0 %1297 }
 0x773   :  { %1668 = vrcp.f32 %v1298_v12 }
 0x77d   :  { %v1295_v7 = vpop.xlane.xlu0 %1294 }
 0x77e   :  { %1670 = vrcp.f32 %v1295_v7 }
 0x780   :  { %v1669_v8 = vpop.eup %1668 }
 0x781   :  { %v1380_v9 = vpop.permute.xlu0 %1379  ;;  %v1302_v10 = vmul.f32 %v1669_v8, %v1665_v3 }
 0x782   :  { %1621 = vmatpush3.msra.mxu0 %v1380_v9 }
 0x783   :  { %1623 = vmatmul.mubr.msk.f32.vlgmr.msra.gmra.mxu0 %vm292_vm3, %v1302_v10 }
 0x78b   :  { %v1671_v14 = vpop.eup %1670 }
 0x78c   :  { %v1300_v15 = vmul.f32 %v1671_v14, %v1667_v5 }
 0x78e   :  { %1618 = vmatmul.mubr.msk.f32.vlgmr.msra.gmra.mxu1 %vm292_vm3, %v1300_v15 }
 0x843   :  { %v1451_v16 = vpop.f32.mrf.mxu0 }
 0x844   :  { %v1456_v23 = vadd.f32 %v1451_v16, %v1124_v49 }
 0x845   :  { %v1624_v18 = vpop.f32.mrf.mxu0 }
 0x846   :  { %v1465_v19 = vadd.f32 %v1512_v17, %v1456_v23 }
 0x848   :  { %1467 = vst.msk [vmem:[#allocation7 + $0x8] sm:$0xff] %vm53_vm0, %v1465_v19 }
 0x84e   :  { %v1375_v20 = vpop.f32.mrf.mxu1 }
 0x84f   :  { %v1455_v21 = vadd.f32 %v1375_v20, %v1123_v55 }
 0x850   :  { %v1619_v22 = vpop.f32.mrf.mxu1 }
 0x851   :  { %v1464_v24 = vadd.f32 %v1512_v17, %v1455_v21 }
 0x853   :  { %1466 = vst.msk [vmem:[#allocation7] sm:$0xff] %vm53_vm0, %v1464_v24 }
 0x854   :  { %1723 = shalt.err (!%p1720_p0)
}
 0x855   :  { %1479 = dma.vmem_to_hbm [thread:$0]  %s1474_s6, 256, %s1941_s3, [#allocation4], %s1739_s15, %s1739_s15, %s1740_s16  }
 0x856   :  { %1736 = dma.done.wait [#allocation4], 256  }
 0x857   :  { %1737 = vsyncadd [#allocation4], 4294967040 }
 0x858   :  { %1483 = vsyncpa [#allocation3], 1 }
 0x859   :  { %1484 = vsyncpa [#allocation6], 1 }
 0x85a   :  { %1485 = vsyncpa [#allocation4], 1 }

</bundles_post_ra>
